<compile_context>
chip_gen: v7x
topology: tpu7x:2x2x1
jax: 0.10.0
libtpu: 0.0.40
codegen_flags: <defaults>
</compile_context>

<pallas_src>
import functools

import jax
import jax.numpy as jnp
from jax import lax
from jax.experimental import pallas as pl
from jax.experimental.pallas import tpu as pltpu


def _round_up(v: int, m: int) -> int:
    return ((v + m - 1) // m) * m


# --------------------------------------------------------------------------------------
# Chip detection / budgets
# --------------------------------------------------------------------------------------
def _chip_info():
    kind = ""
    try:
        kind = jax.devices()[0].device_kind.lower()
    except Exception:
        pass
    vmem_cap = None
    try:
        vmem_cap = int(pltpu.get_tpu_info().vmem_capacity_bytes)
    except Exception:
        vmem_cap = None
    is_v7 = "v7" in kind
    is_v5e = ("v5e" in kind) or ("v5 lite" in kind) or ("v5lite" in kind)
    if vmem_cap is None:
        vmem_cap = (64 << 20) if is_v7 else (128 << 20)
    small_vmem = vmem_cap <= (64 << 20)
    # Do not request all of physical VMEM: leave headroom for Mosaic internal scratch,
    # semaphores and the pipeline's own buffers (tighter on v7x's 64 MiB).
    if small_vmem:
        vmem_limit_cap = max(min(52 << 20, vmem_cap - (8 << 20)), 16 << 20)
    else:
        vmem_limit_cap = max(min(108 << 20, vmem_cap - (16 << 20)), 16 << 20)
    return {
        "kind": kind,
        "vmem_cap": vmem_cap,
        "is_v7": is_v7,
        "is_v5e": is_v5e,
        "small_vmem": small_vmem,
        "vmem_limit_cap": vmem_limit_cap,
    }


def _weight_config(d, m, compute_dtype, chip, hidden_tile=None):
    """Choose hidden-dim tile (tm), padded dims and weight pipeline depth (once per model)."""
    c_sz = jnp.dtype(compute_dtype).itemsize
    d_pad = _round_up(d, 128)
    m_pad128 = _round_up(m, 128)
    tm_min = 256 if chip["is_v7"] else 128

    weight_bytes = 2 * d_pad * m_pad128 * c_sz  # W1 + W2 in compute dtype
    resident_budget = (20 << 20) if chip["small_vmem"] else (40 << 20)

    if hidden_tile is not None:
        tm = min(_round_up(hidden_tile, tm_min), m_pad128)
    elif 2 * weight_bytes <= resident_budget:
        # Fast path: both weight matrices stay VMEM-resident for the whole kernel
        # (constant index_maps -> DMA'd exactly once, no re-streaming per row tile).
        tm = m_pad128
    else:
        tm = min(256 if chip["small_vmem"] else 512, m_pad128)

    # Keep the double-buffered weight chunks under ~45% of the VMEM budget.
    while tm > tm_min and (2 * (2 * d_pad * tm) * c_sz) > int(chip["vmem_limit_cap"] * 0.45):
        tm = max(tm // 2, tm_min)
    tm = max(tm, tm_min) if m_pad128 >= tm_min else m_pad128

    m_pad = _round_up(m, tm)
    m_tiles = m_pad // tm
    # v5e: spend VMEM headroom on a 3-deep weight pipeline instead of a larger tn.
    w_buf = 3 if (chip["is_v5e"] and m_tiles > 1) else 2
    return d_pad, m_pad, tm, w_buf


def _row_config(n, d_pad, tm, compute_dtype, out_dtype, chip, w_buf, row_tile=None):
    """Choose the row tile (tn) from the per-generation target and the VMEM budget."""
    c_sz = jnp.dtype(compute_dtype).itemsize
    o_sz = jnp.dtype(out_dtype).itemsize
    sublane = max(8, 8 * (4 // c_sz), 8 * (4 // o_sz))
    use_scratch = jnp.dtype(out_dtype) != jnp.dtype(jnp.float32)

    budget = int(chip["vmem_limit_cap"] * 0.9)
    fixed = (w_buf * (2 * d_pad * tm) * c_sz      # W1 + W2 chunks (pipelined)
             + 2 * (tm + d_pad) * 4)              # bias chunks (f32)
    per_row = (2 * d_pad * c_sz                   # x tile (double buffered)
               + 2 * d_pad * o_sz                 # output tile (double buffered)
               + (d_pad * 4 if use_scratch else 0)  # f32 accumulator scratch
               + 2 * tm * 4                       # (tn, tm) f32 hidden temporaries
               + (tm * c_sz if c_sz != 4 else 0)  # compute-dtype cast of hidden
               + d_pad * 4)                       # misc margin

    if row_tile is not None:
        tn_target = row_tile
    elif chip["is_v5e"]:
        tn_target = 384     # v5e roofline ~240 FLOP/byte -> modest tn is already balanced
    elif chip["small_vmem"]:
        tn_target = 512     # v7x-class (64 MiB VMEM)
    else:
        tn_target = 1024    # v6e-class (128 MiB VMEM)

    max_tn = max((budget - fixed) // per_row, sublane)
    tn = min(tn_target, max_tn, _round_up(n, sublane))
    tn = max((tn // sublane) * sublane, sublane)

    # v7x: the 'parallel' row axis shards across the two TensorCores — prefer >= 2 tiles.
    if chip["is_v7"] and tn >= n and n > sublane:
        tn = max(_round_up(-(-n // 2), sublane), sublane)

    n_pad = _round_up(n, tn)
    vmem_est = fixed + tn * per_row + (4 << 20)
    vmem_limit = int(min(max(vmem_est, 32 << 20), chip["vmem_limit_cap"]))
    return tn, n_pad, vmem_limit, use_scratch, sublane


# --------------------------------------------------------------------------------------
# Kernels
# --------------------------------------------------------------------------------------
def _mlp_contrib(x_ref, w1_ref, b1_ref, w2_ref, approximate):
    # First linear chunk on the MXU, f32 accumulation, + f32 bias chunk.
    h = jnp.dot(x_ref[...], w1_ref[...], preferred_element_type=jnp.float32)
    h = h + b1_ref[...]
    if approximate:
        # tanh-approx GELU: transcendental goes to the EUP (separate VLIW slot).
        h = jax.nn.gelu(h, approximate=True)
    else:
        # Exact erf GELU in f32 — matches torch.nn.GELU default.
        h = 0.5 * h * (1.0 + lax.erf(h * jnp.float32(0.7071067811865476)))
    # Second linear chunk, f32 accumulation.
    return jnp.dot(h.astype(w2_ref.dtype), w2_ref[...], preferred_element_type=jnp.float32)


def _mlp_kernel_accum_out(x_ref, w1_ref, b1_ref, w2_ref, b2_ref, o_ref, *, approximate):
    """f32 output: accumulate directly into the resident output tile (no scratch)."""
    j = pl.program_id(1)
    contrib = _mlp_contrib(x_ref, w1_ref, b1_ref, w2_ref, approximate)

    @pl.when(j == 0)
    def _init():
        o_ref[...] = contrib + b2_ref[...]          # b2 added exactly once

    @pl.when(j != 0)
    def _acc():
        o_ref[...] += contrib


def _mlp_kernel_scratch(x_ref, w1_ref, b1_ref, w2_ref, b2_ref, o_ref, acc_ref, *, approximate):
    """Non-f32 output: f32 accumulator scratch, cast to the output dtype at finalize."""
    j = pl.program_id(1)
    contrib = _mlp_contrib(x_ref, w1_ref, b1_ref, w2_ref, approximate)

    @pl.when(j == 0)
    def _init():
        acc_ref[...] = contrib

    @pl.when(j != 0)
    def _acc():
        acc_ref[...] += contrib

    @pl.when(j == pl.num_programs(1) - 1)
    def _finalize():
        o_ref[...] = (acc_ref[...] + b2_ref[...]).astype(o_ref.dtype)


# --------------------------------------------------------------------------------------
# Wrapper: weights are padded/cast ONCE; the jitted forward only touches activations.
# --------------------------------------------------------------------------------------
def make_mlp_block(w1, b1, w2, b2, *, compute_dtype=jnp.float32, approximate_gelu=False,
                   row_tile=None, hidden_tile=None):
    """Build an MLPBlock forward.  w1: (D, M), b1: (M,), w2: (M, D), b2: (D,)."""
    d, m = int(w1.shape[0]), int(w1.shape[1])
    assert w2.shape == (m, d) and b1.shape == (m,) and b2.shape == (d,)

    chip = _chip_info()
    d_pad, m_pad, tm, w_buf = _weight_config(d, m, compute_dtype, chip, hidden_tile)
    m_tiles = m_pad // tm

    # One-time weight pad + cast (hoisted out of the per-call path).  Zero-padding is
    # exact: padded K rows/cols contribute 0, padded bias is 0, GELU(0) = 0.
    w1_p = jnp.zeros((d_pad, m_pad), compute_dtype).at[:d, :m].set(w1.astype(compute_dtype))
    w2_p = jnp.zeros((m_pad, d_pad), compute_dtype).at[:m, :d].set(w2.astype(compute_dtype))
    b1_p = jnp.zeros((1, m_pad), jnp.float32).at[0, :m].set(b1.astype(jnp.float32))
    b2_p = jnp.zeros((1, d_pad), jnp.float32).at[0, :d].set(b2.astype(jnp.float32))
    w1_p, w2_p, b1_p, b2_p = jax.block_until_ready((w1_p, w2_p, b1_p, b2_p))

    def _fwd(x, w1_pp, b1_pp, w2_pp, b2_pp):
        orig_shape = x.shape
        assert orig_shape[-1] == d
        out_dtype = x.dtype
        x2d = x.reshape(-1, d)
        n = x2d.shape[0]

        tn, n_pad, vmem_limit, use_scratch, _ = _row_config(
            n, d_pad, tm, compute_dtype, out_dtype, chip, w_buf, row_tile)

        # Skip the activation padding copy when shapes/dtype are already aligned.
        if n_pad == n and d_pad == d:
            x_in = x2d if x2d.dtype == jnp.dtype(compute_dtype) else x2d.astype(compute_dtype)
        else:
            x_in = jnp.zeros((n_pad, d_pad), compute_dtype).at[:n, :d].set(
                x2d.astype(compute_dtype))

        # Weight BlockSpecs: constant index_maps when tm == m_pad (weights VMEM-resident,
        # DMA'd exactly once); optional 3-deep pipeline on v5e when re-streamed.
        w_kwargs = {} if w_buf == 2 else {"pipeline_mode": pl.Buffered(w_buf)}
        in_specs = [
            pl.BlockSpec((tn, d_pad), lambda i, j: (i, 0)),            # x row tile
            pl.BlockSpec((d_pad, tm), lambda i, j: (0, j), **w_kwargs),  # W1 M-chunk
            pl.BlockSpec((1, tm),     lambda i, j: (0, j)),            # b1 M-chunk
            pl.BlockSpec((tm, d_pad), lambda i, j: (j, 0), **w_kwargs),  # W2 M-chunk
            pl.BlockSpec((1, d_pad),  lambda i, j: (0, 0)),            # b2
        ]
        out_spec = pl.BlockSpec((tn, d_pad), lambda i, j: (i, 0))

        if use_scratch:
            kernel = functools.partial(_mlp_kernel_scratch, approximate=approximate_gelu)
            scratch = [pltpu.VMEM((tn, d_pad), jnp.float32)]
        else:
            kernel = functools.partial(_mlp_kernel_accum_out, approximate=approximate_gelu)
            scratch = []

        out_p = pl.pallas_call(
            kernel,
            out_shape=jax.ShapeDtypeStruct((n_pad, d_pad), out_dtype),
            grid_spec=pltpu.PrefetchScalarGridSpec(
                num_scalar_prefetch=0,
                grid=(n_pad // tn, m_tiles),
                in_specs=in_specs,
                out_specs=out_spec,
                scratch_shapes=scratch,
            ),
            compiler_params=pltpu.CompilerParams(
                dimension_semantics=("parallel", "arbitrary"),
                vmem_limit_bytes=vmem_limit,
            ),
        )(x_in, w1_pp, b1_pp, w2_pp, b2_pp)

        if n_pad != n or d_pad != d:
            out_p = out_p[:n, :d]
        return out_p.reshape(orig_shape)

    fwd = jax.jit(_fwd)

    def apply(x):
        return fwd(x, w1_p, b1_p, w2_p, b2_p)

    return apply


# Convenience single-shot API (pads weights per call; prefer make_mlp_block in loops).
def mlp_block(x, w1, b1, w2, b2, **kwargs):
    return make_mlp_block(w1, b1, w2, b2, **kwargs)(x)


if __name__ == "__main__":
    # Small shapes consistent with the module: tokens of embedding_dim D, hidden mlp_size M.
    batch, seq, embedding_dim, mlp_size = 2, 8, 32, 128

    key = jax.random.PRNGKey(0)
    kx, kw1, kb1, kw2, kb2 = jax.random.split(key, 5)

    x = jax.random.normal(kx, (batch, seq, embedding_dim), dtype=jnp.float32)
    w1 = jax.random.normal(kw1, (embedding_dim, mlp_size), dtype=jnp.float32) * (
        1.0 / jnp.sqrt(embedding_dim))
    b1 = jax.random.normal(kb1, (mlp_size,), dtype=jnp.float32) * 0.01
    w2 = jax.random.normal(kw2, (mlp_size, embedding_dim), dtype=jnp.float32) * (
        1.0 / jnp.sqrt(mlp_size))
    b2 = jax.random.normal(kb2, (embedding_dim,), dtype=jnp.float32) * 0.01

    # Pure-JAX reference (exact erf GELU, dropout p=0 is identity), full-precision matmuls.
    x2d = x.reshape(batch * seq, embedding_dim)
    ref = jnp.dot(x2d, w1, precision=lax.Precision.HIGHEST) + b1
    ref = 0.5 * ref * (1.0 + lax.erf(ref / jnp.sqrt(2.0)))
    ref = (jnp.dot(ref, w2, precision=lax.Precision.HIGHEST) + b2).reshape(
        batch, seq, embedding_dim)

    # 1) Exact-semantics path (f32 matmuls, exact erf GELU) — PyTorch parity.
    mlp_exact = make_mlp_block(w1, b1, w2, b2, compute_dtype=jnp.float32)
    out_f32 = jax.block_until_ready(mlp_exact(x))
    assert out_f32.shape == ref.shape and out_f32.dtype == ref.dtype
    assert jnp.allclose(out_f32, ref, atol=2e-3, rtol=2e-3), "f32 path mismatch vs reference"

    # 2) Perf path: bf16 MXU streaming (f32 accumulation) + tanh-approx GELU.
    mlp_fast = make_mlp_block(w1, b1, w2, b2, compute_dtype=jnp.bfloat16,
                              approximate_gelu=True)
    out_fast = jax.block_until_ready(mlp_fast(x))
    assert out_fast.dtype == jnp.float32
    assert jnp.allclose(out_fast, ref, atol=8e-2, rtol=8e-2), "bf16 path mismatch vs reference"

    # 3) bf16 activations end-to-end (exercises the scratch-accumulator kernel).
    out_bf16 = jax.block_until_ready(mlp_fast(x.astype(jnp.bfloat16)))
    assert out_bf16.dtype == jnp.bfloat16
    assert jnp.allclose(out_bf16.astype(jnp.float32), ref, atol=1.5e-1, rtol=1e-1), \
        "bf16-activation path mismatch vs reference"

    print("KERNEL_OK")
</pallas_src>

<mosaic_0001>
module attributes {stable_mosaic.version = 11 : i64} {
  func.func @_mlp_kernel_accum_out(%arg0: i32, %arg1: i32, %arg2: memref<16x128xf32, #tpu.memory_space<vmem>>, %arg3: memref<128x128xf32, #tpu.memory_space<vmem>>, %arg4: memref<1x128xf32, #tpu.memory_space<vmem>>, %arg5: memref<128x128xf32, #tpu.memory_space<vmem>>, %arg6: memref<1x128xf32, #tpu.memory_space<vmem>>, %arg7: memref<16x128xf32, #tpu.memory_space<vmem>>) attributes {dimension_semantics = [#tpu.dimension_semantics<parallel>, #tpu.dimension_semantics<arbitrary>], iteration_bounds = array<i64: 1, 1>, scalar_prefetch = 0 : i64, scratch_operands = 0 : i64, tpu.core_type = #tpu.core_type<tc>, window_params = [{transform_indices = @transform_0, window_bounds = array<i64: 16, 128>}, {transform_indices = @transform_1, window_bounds = array<i64: 128, 128>}, {transform_indices = @transform_2, window_bounds = array<i64: 1, 128>}, {transform_indices = @transform_3, window_bounds = array<i64: 128, 128>}, {pipeline_mode = #tpu.pipeline_mode<synchronous>, transform_indices = @transform_4, window_bounds = array<i64: 1, 128>}, {transform_indices = @transform_5, window_bounds = array<i64: 16, 128>}]} {
    %c0 = arith.constant 0 : index
    %c0_0 = arith.constant 0 : index
    %0 = vector.load %arg2[%c0, %c0_0] : memref<16x128xf32, #tpu.memory_space<vmem>>, vector<16x128xf32>
    %c0_1 = arith.constant 0 : index
    %c0_2 = arith.constant 0 : index
    %1 = vector.load %arg3[%c0_1, %c0_2] : memref<128x128xf32, #tpu.memory_space<vmem>>, vector<128x128xf32>
    %cst = arith.constant dense<0.000000e+00> : vector<16x128xf32>
    %2 = tpu.matmul %0, %1, %cst {dimension_numbers = #tpu.dot_dimension_numbers<[1], [0], [0], [1], [0, 0, 1, 1], [], []>} : vector<16x128xf32>, vector<128x128xf32>, vector<16x128xf32> -> vector<16x128xf32>
    %c0_3 = arith.constant 0 : index
    %c0_4 = arith.constant 0 : index
    %3 = vector.load %arg4[%c0_3, %c0_4] : memref<1x128xf32, #tpu.memory_space<vmem>>, vector<1x128xf32>
    %4 = vector.broadcast %3 : vector<1x128xf32> to vector<16x128xf32>
    %5 = arith.addf %2, %4 : vector<16x128xf32>
    %cst_5 = arith.constant 5.000000e-01 : f32
    %6 = vector.broadcast %cst_5 : f32 to vector<16x128xf32>
    %7 = arith.mulf %6, %5 : vector<16x128xf32>
    %cst_6 = arith.constant 0.707106769 : f32
    %8 = vector.broadcast %cst_6 : f32 to vector<16x128xf32>
    %9 = arith.mulf %5, %8 : vector<16x128xf32>
    %10 = math.erf %9 : vector<16x128xf32>
    %cst_7 = arith.constant 1.000000e+00 : f32
    %11 = vector.broadcast %cst_7 : f32 to vector<16x128xf32>
    %12 = arith.addf %11, %10 : vector<16x128xf32>
    %13 = arith.mulf %7, %12 : vector<16x128xf32>
    %c0_8 = arith.constant 0 : index
    %c0_9 = arith.constant 0 : index
    %14 = vector.load %arg5[%c0_8, %c0_9] : memref<128x128xf32, #tpu.memory_space<vmem>>, vector<128x128xf32>
    %cst_10 = arith.constant dense<0.000000e+00> : vector<16x128xf32>
    %15 = tpu.matmul %13, %14, %cst_10 {dimension_numbers = #tpu.dot_dimension_numbers<[1], [0], [0], [1], [0, 0, 1, 1], [], []>} : vector<16x128xf32>, vector<128x128xf32>, vector<16x128xf32> -> vector<16x128xf32>
    %c0_i32 = arith.constant 0 : i32
    %16 = arith.cmpi eq, %arg1, %c0_i32 : i32
    %17 = arith.extui %16 : i1 to i32
    %c0_i32_11 = arith.constant 0 : i32
    %18 = arith.cmpi ne, %17, %c0_i32_11 : i32
    scf.if %18 {
      %c0_14 = arith.constant 0 : index
      %c0_15 = arith.constant 0 : index
      %22 = vector.load %arg6[%c0_14, %c0_15] : memref<1x128xf32, #tpu.memory_space<vmem>>, vector<1x128xf32>
      %23 = vector.broadcast %22 : vector<1x128xf32> to vector<16x128xf32>
      %24 = arith.addf %15, %23 : vector<16x128xf32>
      %c0_16 = arith.constant 0 : index
      %c0_17 = arith.constant 0 : index
      %25 = vector.load %arg7[%c0_16, %c0_17] : memref<16x128xf32, #tpu.memory_space<vmem>>, vector<16x128xf32>
      tpu.vector_store %arg7[%c0_16, %c0_17], %24 {strides = array<i32>} : memref<16x128xf32, #tpu.memory_space<vmem>>, vector<16x128xf32>,
    } else {
    }
    %c0_i32_12 = arith.constant 0 : i32
    %19 = arith.cmpi ne, %arg1, %c0_i32_12 : i32
    %20 = arith.extui %19 : i1 to i32
    %c0_i32_13 = arith.constant 0 : i32
    %21 = arith.cmpi ne, %20, %c0_i32_13 : i32
    scf.if %21 {
      %c0_14 = arith.constant 0 : index
      %c0_15 = arith.constant 0 : index
      %22 = vector.load %arg7[%c0_14, %c0_15] : memref<16x128xf32, #tpu.memory_space<vmem>>, vector<16x128xf32>
      %23 = arith.addf %22, %15 : vector<16x128xf32>
      %c0_16 = arith.constant 0 : index
      %c0_17 = arith.constant 0 : index
      %24 = vector.load %arg7[%c0_16, %c0_17] : memref<16x128xf32, #tpu.memory_space<vmem>>, vector<16x128xf32>
      tpu.vector_store %arg7[%c0_16, %c0_17], %23 {strides = array<i32>} : memref<16x128xf32, #tpu.memory_space<vmem>>, vector<16x128xf32>,
    } else {
    }
    return
  }
  func.func @transform_0(%arg0: i32, %arg1: i32) -> (i32, i32) {
    %c0_i32 = arith.constant 0 : i32
    %c0_i32_0 = arith.constant 0 : i32
    return %arg0, %c0_i32 : i32, i32
  }
  func.func @transform_1(%arg0: i32, %arg1: i32) -> (i32, i32) {
    %c0_i32 = arith.constant 0 : i32
    %c0_i32_0 = arith.constant 0 : i32
    return %c0_i32, %arg1 : i32, i32
  }
  func.func @transform_2(%arg0: i32, %arg1: i32) -> (i32, i32) {
    %c0_i32 = arith.constant 0 : i32
    %c0_i32_0 = arith.constant 0 : i32
    return %c0_i32, %arg1 : i32, i32
  }
  func.func @transform_3(%arg0: i32, %arg1: i32) -> (i32, i32) {
    %c0_i32 = arith.constant 0 : i32
    %c0_i32_0 = arith.constant 0 : i32
    return %arg1, %c0_i32 : i32, i32
  }
  func.func @transform_4(%arg0: i32, %arg1: i32) -> (i32, i32) {
    %c0_i32 = arith.constant 0 : i32
    %c0_i32_0 = arith.constant 0 : i32
    %c0_i32_1 = arith.constant 0 : i32
    return %c0_i32, %c0_i32_0 : i32, i32
  }
  func.func @transform_5(%arg0: i32, %arg1: i32) -> (i32, i32) {
    %c0_i32 = arith.constant 0 : i32
    %c0_i32_0 = arith.constant 0 : i32
    return %arg0, %c0_i32 : i32, i32
  }
}

</mosaic_0001>

<bundles_post_ra>
// kernel: _fwd.1
= control target key start
LH: loop header
LB: loop body
LE: loop exit
PB: predicated region body
PF: predicated region fallthrough
CT: control target
= control target key end

     0   :  { %10 = vsyncpa [#allocation3], 0  ;;  %s584_s0 = inlined_call_operand.vmem [shape: f32[16,128], index: 0, kind: input, shape index: {}]   ;;  %s585_s1 = inlined_call_operand.hbm [shape: f32[128,128], index: 1, kind: input, shape index: {}]   ;;  %s586_s2 = inlined_call_operand.vmem [shape: f32[1,128], index: 2, kind: input, shape index: {}]   ;;  %s587_s3 = inlined_call_operand.hbm [shape: f32[128,128], index: 3, kind: input, shape index: {}]   ;;  %s588_s4 = inlined_call_operand.vmem [shape: f32[1,128], index: 4, kind: input, shape index: {}]   ;;  %s589_s5 = inlined_call_operand.vmem [shape: f32[16,128], index: 5, kind: output, shape index: {}]  }
   0x1   :  { %11 = vsyncpa [#allocation5], 0  ;;  %s508_s18 = smov [#allocation2]   ;;  %s460_s22 = scalar_lea.hbm %s585_s1, 2048 }
   0x2   :  { %s19_s19 = sshll.u32 %s508_s18, 4  ;;  %p461_p0 = scmp.ne.s32.totalorder %s585_s1, %s460_s22  ;;  %s20_s19 = int_to_ptr.vmem [resolvable:$true] %s19_s19 }
   0x3   :  { %p464_p1 = scmp.lt.u32.totalorder %s460_s22, %s585_s1 }
   0x5   :  { %p466_p2 = pnand %p464_p1, %p461_p0 }
   0x7   :  { %469 = shalt.err (!%p466_p2)
}
   0x8   :  { %s470_s27 = scalar_lea.vmem %s20_s19, 2048  ;;  %p475_p4 = scmp.lt.s32.totalorder %s20_s19, %s20_s19 }
   0x9   :  { %p471_p3 = scmp.ne.s32.totalorder %s20_s19, %s470_s27  ;;  %p476_p5 = scmp.lt.s32.totalorder %s470_s27, %s470_s27 }
   0xb   :  { %p477_p6 = por %p476_p5, %p475_p4 }
   0xd   :  { %p478_p7 = pnand %p477_p6, %p471_p3 }
   0xf   :  { %481 = shalt.err (!%p478_p7)
}
  0x10   :  { %s509_s28 = smov 128   ;;  %s510_s29 = smov 8  }
  0x11   :  { %25 = dma.hbm_to_vmem [thread:$0]  %s585_s1, 2048, %s20_s19, [#allocation3], %s509_s28, %s509_s28, %s510_s29  }
  0x12   :  { %s511_s7 = smov [#allocation4]   ;;  %s482_s11 = scalar_lea.hbm %s587_s3, 2048 }
  0x13   :  { %s33_s8 = sshll.u32 %s511_s7, 4  ;;  %p483_p8 = scmp.ne.s32.totalorder %s587_s3, %s482_s11  ;;  %s34_s8 = int_to_ptr.vmem [resolvable:$true] %s33_s8 }
  0x14   :  { %p486_p9 = scmp.lt.u32.totalorder %s482_s11, %s587_s3 }
  0x16   :  { %p488_p10 = pnand %p486_p9, %p483_p8 }
  0x18   :  { %491 = shalt.err (!%p488_p10)
}
  0x19   :  { %s492_s16 = scalar_lea.vmem %s34_s8, 2048  ;;  %p497_p12 = scmp.lt.s32.totalorder %s34_s8, %s34_s8 }
  0x1a   :  { %p493_p11 = scmp.ne.s32.totalorder %s34_s8, %s492_s16  ;;  %p498_p13 = scmp.lt.s32.totalorder %s492_s16, %s492_s16 }
  0x1c   :  { %p499_p0 = por %p498_p13, %p497_p12 }
  0x1e   :  { %p500_p1 = pnand %p499_p0, %p493_p11 }
  0x20   :  { %503 = shalt.err (!%p500_p1)
}
  0x21   :  { %39 = dma.hbm_to_vmem [thread:$0]  %s587_s3, 2048, %s34_s8, [#allocation5], %s509_s28, %s509_s28, %s510_s29  }
  0x22   :  { %504 = dma.done.wait [#allocation3], 2048  }
  0x23   :  { %505 = vsyncadd [#allocation3], 4294965248 }
  0x24   :  { %506 = dma.done.wait [#allocation5], 2048  }
  0x25   :  { %507 = vsyncadd [#allocation5], 4294965248  ;;  %v50_v0 = vld [vmem:[#allocation2] sm:$0xff]  ;;  %v51_v1 = vld [vmem:[#allocation2 + $0x8] sm:$0xff] }
  0x26   :  { %v52_v2 = vld [vmem:[#allocation2 + $0x10] sm:$0xff]  ;;  %v388_v3 = vpack.c.bf16 %v51_v1, %v50_v0  ;;  %v53_v4 = vld [vmem:[#allocation2 + $0x18] sm:$0xff]  ;;  %v54_v6 = vld [vmem:[#allocation2 + $0x20] sm:$0xff] }
  0x27   :  { %v392_v5 = vpack.c.bf16 %v53_v4, %v52_v2  ;;  %v55_v7 = vld [vmem:[#allocation2 + $0x28] sm:$0xff]  ;;  %v56_v9 = vld [vmem:[#allocation2 + $0x30] sm:$0xff]  ;;  %v57_v10 = vld [vmem:[#allocation2 + $0x38] sm:$0xff] }
  0x28   :  { %389 = vmatprep.subr.bf16.mxu0 %v388_v3  ;;  %v396_v8 = vpack.c.bf16 %v55_v7, %v54_v6  ;;  %v48_v11 = vld [vmem:[%s584_s0] sm:$0xff]  ;;  %v159_v13 = vld [vmem:[#allocation4 + $0x8] sm:$0xff]  ;;  %v160_v14 = vld [vmem:[#allocation4 + $0x10] sm:$0xff]  ;;  %v400_v20 = vpack.c.bf16 %v57_v10, %v56_v9 }
  0x29   :  { %391 = vmatpush3.bf16.msra.mxu0 %v388_v3  ;;  %350 = vmatprep.mubr.f32.mxu0 %v48_v11  ;;  %v158_v12 = vld [vmem:[#allocation4] sm:$0xff]  ;;  %v161_v16 = vld [vmem:[#allocation4 + $0x18] sm:$0xff]  ;;  %v163_v19 = vld [vmem:[#allocation4 + $0x28] sm:$0xff] }
  0x2a   :  { %393 = vmatprep.subr.bf16.mxu0 %v392_v5  ;;  %v420_v15 = vpack.c.bf16 %v159_v13, %v158_v12  ;;  %v424_v17 = vpack.c.bf16 %v161_v16, %v160_v14  ;;  %v162_v18 = vld [vmem:[#allocation4 + $0x20] sm:$0xff]  ;;  %v59_v22 = vld [vmem:[#allocation2 + $0x48] sm:$0xff]  ;;  %v60_v25 = vld [vmem:[#allocation2 + $0x50] sm:$0xff] }
  0x2b   :  { %v58_v21 = vld [vmem:[#allocation2 + $0x40] sm:$0xff]  ;;  %v428_v23 = vpack.c.bf16 %v163_v19, %v162_v18  ;;  %v61_v26 = vld [vmem:[#allocation2 + $0x58] sm:$0xff]  ;;  %v63_v29 = vld [vmem:[#allocation2 + $0x68] sm:$0xff] }
  0x2c   :  { %421 = vmatprep.subr.bf16.mxu1 %v420_v15  ;;  %v404_v24 = vpack.c.bf16 %v59_v22, %v58_v21  ;;  %v408_v27 = vpack.c.bf16 %v61_v26, %v60_v25  ;;  %v62_v28 = vld [vmem:[#allocation2 + $0x60] sm:$0xff]  ;;  %v64_v31 = vld [vmem:[#allocation2 + $0x70] sm:$0xff]  ;;  %v65_v32 = vld [vmem:[#allocation2 + $0x78] sm:$0xff] }
  0x2d   :  { %395 = vmatpush3.bf16.msra.mxu0 %v392_v5  ;;  %423 = vmatpush3.bf16.msra.mxu1 %v420_v15  ;;  %v412_v30 = vpack.c.bf16 %v63_v29, %v62_v28  ;;  %v416_v33 = vpack.c.bf16 %v65_v32, %v64_v31  ;;  %v49_v34 = vld [vmem:[%s584_s0 + $0x8] sm:$0xff]  ;;  %v164_v35 = vld [vmem:[#allocation4 + $0x30] sm:$0xff]  ;;  %v165_v36 = vld [vmem:[#allocation4 + $0x38] sm:$0xff] }
  0x2e   :  { %397 = vmatprep.subr.bf16.mxu0 %v396_v8  ;;  %425 = vmatprep.subr.bf16.mxu1 %v424_v17  ;;  %v432_v37 = vpack.c.bf16 %v165_v36, %v164_v35  ;;  %v166_v38 = vld [vmem:[#allocation4 + $0x40] sm:$0xff]  ;;  %v167_v39 = vld [vmem:[#allocation4 + $0x48] sm:$0xff]  ;;  %v168_v41 = vld [vmem:[#allocation4 + $0x50] sm:$0xff] }
  0x2f   :  { %v436_v40 = vpack.c.bf16 %v167_v39, %v166_v38  ;;  %v169_v42 = vld [vmem:[#allocation4 + $0x58] sm:$0xff]  ;;  %v170_v44 = vld [vmem:[#allocation4 + $0x60] sm:$0xff]  ;;  %v171_v45 = vld [vmem:[#allocation4 + $0x68] sm:$0xff] }
  0x30   :  { %v440_v43 = vpack.c.bf16 %v169_v42, %v168_v41  ;;  %v444_v46 = vpack.c.bf16 %v171_v45, %v170_v44  ;;  %v172_v47 = vld [vmem:[#allocation4 + $0x70] sm:$0xff]  ;;  %v173_v48 = vld [vmem:[#allocation4 + $0x78] sm:$0xff]  ;;  %v280_v50 = vld [vmem:[%s586_s2] ss:$0 sm:$0xff] }
  0x31   :  { %399 = vmatpush3.bf16.msra.mxu0 %v396_v8  ;;  %427 = vmatpush3.bf16.msra.mxu1 %v424_v17  ;;  %v448_v49 = vpack.c.bf16 %v173_v48, %v172_v47  ;;  %v281_v1 = vld [vmem:[%s588_s4] ss:$0 sm:$0xff] }
  0x32   :  { %401 = vmatprep.subr.bf16.mxu0 %v400_v20  ;;  %429 = vmatprep.subr.bf16.mxu1 %v428_v23 }
  0x35   :  { %403 = vmatpush3.bf16.msra.mxu0 %v400_v20  ;;  %431 = vmatpush3.bf16.msra.mxu1 %v428_v23 }
  0x36   :  { %405 = vmatprep.subr.bf16.mxu0 %v404_v24  ;;  %433 = vmatprep.subr.bf16.mxu1 %v432_v37 }
  0x39   :  { %407 = vmatpush3.bf16.msra.mxu0 %v404_v24  ;;  %435 = vmatpush3.bf16.msra.mxu1 %v432_v37 }
  0x3a   :  { %409 = vmatprep.subr.bf16.mxu0 %v408_v27  ;;  %437 = vmatprep.subr.bf16.mxu1 %v436_v40 }
  0x3d   :  { %411 = vmatpush3.bf16.msra.mxu0 %v408_v27  ;;  %439 = vmatpush3.bf16.msra.mxu1 %v436_v40 }
  0x3e   :  { %413 = vmatprep.subr.bf16.mxu0 %v412_v30  ;;  %441 = vmatprep.subr.bf16.mxu1 %v440_v43 }
  0x41   :  { %415 = vmatpush3.bf16.msra.mxu0 %v412_v30  ;;  %443 = vmatpush3.bf16.msra.mxu1 %v440_v43 }
  0x42   :  { %417 = vmatprep.subr.bf16.mxu0 %v416_v33  ;;  %445 = vmatprep.subr.bf16.mxu1 %v444_v46 }
  0x45   :  { %419 = vmatpush3.bf16.msra.mxu0 %v416_v33  ;;  %447 = vmatpush3.bf16.msra.mxu1 %v444_v46 }
  0x46   :  { %449 = vmatprep.subr.bf16.mxu1 %v448_v49 }
  0x48   :  { %351 = vmatmul.mubr.f32.vlgmr.msra.gmra.mrb[0].mxu0 %v49_v34 }
  0x49   :  { %451 = vmatpush3.bf16.msra.mxu1 %v448_v49 }
 0x11b   :  { %v352_v51 = vpop.f32.mrb[0].mxu0 }
 0x11c   :  { %v145_v52 = vadd.f32 %v352_v51, %v280_v50  ;;  %v139_v53 = vpop.f32.mrb[1].mxu0 }
 0x11d   :  { %v140_v54 = vadd.f32 %v280_v50, %v139_v53 }
 0x11e   :  { %v151_v55 = vmul.f32 0.70710677, %v145_v52  ;;  %v149_v62 = vmul.f32 0.5, %v145_v52 }
 0x11f   :  { %v150_v56 = vmul.f32 0.70710677, %v140_v54  ;;  %v148_v60 = vmul.f32 0.5, %v140_v54 }
 0x120   :  { %456 = verf.f32 %v151_v55 }
 0x121   :  { %458 = verf.f32 %v150_v56 }
 0x12a   :  { %v457_v57 = vpop.eup %456 }
 0x12b   :  { %v459_v58 = vpop.eup %458  ;;  %v155_v59 = vadd.f32 1.0, %v457_v57 }
 0x12c   :  { %v154_v61 = vadd.f32 1.0, %v459_v58 }
 0x12d   :  { %v157_v0 = vmul.f32 %v155_v59, %v149_v62 }
 0x12e   :  { %v156_v63 = vmul.f32 %v154_v61, %v148_v60 }
 0x130   :  { %385 = vmatprep.mubr.f32.mxu1 %v156_v63 }
 0x131   :  { %386 = vmatmul.mubr.f32.vlgmr.msra.gmra.mrb[0].mxu1 %v157_v0 }
 0x204   :  { %v387_v2 = vpop.f32.mrb[0].mxu1 }
 0x205   :  { %v261_v3 = vadd.f32 %v387_v2, %v281_v1  ;;  %v240_v4 = vpop.f32.mrb[1].mxu1 }
 0x206   :  { %v260_v5 = vadd.f32 %v281_v1, %v240_v4 }
 0x207   :  { %263 = vst [vmem:[%s589_s5 + $0x8] sm:$0xff] %v261_v3 }
 0x208   :  { %262 = vst [vmem:[%s589_s5] sm:$0xff] %v260_v5 }
 0x209   :  { %278 = vsyncpa [#allocation3], 1 }
 0x20a   :  { %279 = vsyncpa [#allocation5], 1 }

</bundles_post_ra>
